<compile_context>
chip_gen: v7x
topology: tpu7x:2x2x1
jax: 0.10.0
libtpu: 0.0.40
codegen_flags: <defaults>
</compile_context>

<pallas_src>
import jax
import jax.numpy as jnp
from jax.experimental import pallas as pl
from jax.experimental.pallas import tpu as pltpu

_LANES = 128
_SUBLANES = 8


def _round_up(v, m):
    return ((v + m - 1) // m) * m


def _sigmoid(x):
    # Identical to 1/(1+exp(-x)) but a single EUP transcendental (tanh).
    return 0.5 * jnp.tanh(0.5 * x) + 0.5


def _predator_kernel(x_ref, w1_ref, b1_ref, w2_ref, b2_ref, w3_ref, b3_ref, o_ref):
    # sigmoid(input) in f32; cast to bf16 only to feed the MXU (f32 accumulate).
    x = _sigmoid(x_ref[...])

    h1 = _sigmoid(
        jnp.dot(x.astype(jnp.bfloat16), w1_ref[...],
                preferred_element_type=jnp.float32) + b1_ref[...])
    h2 = _sigmoid(
        jnp.dot(h1.astype(jnp.bfloat16), w2_ref[...],
                preferred_element_type=jnp.float32) + b2_ref[...])
    logits = (jnp.dot(h2.astype(jnp.bfloat16), w3_ref[...],
                      preferred_element_type=jnp.float32) + b3_ref[...])

    # softmax over dim=1 (only the logical n_output lanes exist here), f32 throughout.
    m = jnp.max(logits, axis=1, keepdims=True)
    e = jnp.exp(logits - m)
    s = jnp.sum(e, axis=1, keepdims=True)
    o_ref[...] = e * pl.reciprocal(s, approx=True)


def prepare_params(params):
    """One-time prep: transpose to (in, out), zero-pad hidden dims to 128 lanes,
    cast weights to bf16 for the MXU. Call once at init, reuse every forward."""
    w1, b1 = params["w1"], params["b1"]   # (n_hidden, n_input), (n_hidden,)
    w2, b2 = params["w2"], params["b2"]   # (n_hidden, n_hidden), (n_hidden,)
    w3, b3 = params["w3"], params["b3"]   # (n_output, n_hidden), (n_output,)

    n_hidden, n_input = w1.shape
    n_output = w3.shape[0]
    h_pad = _round_up(n_hidden, _LANES)
    f32, bf16 = jnp.float32, jnp.bfloat16

    # Padded hidden lanes: pre-activation 0 -> sigmoid = 0.5, but the next layer's
    # padded-K rows are zero, so they contribute nothing. No output padding at all.
    w1_t = jnp.zeros((n_input, h_pad), f32).at[:, :n_hidden].set(w1.T.astype(f32)).astype(bf16)
    b1_p = jnp.zeros((1, h_pad), f32).at[:, :n_hidden].set(b1.astype(f32))
    w2_t = jnp.zeros((h_pad, h_pad), f32).at[:n_hidden, :n_hidden].set(w2.T.astype(f32)).astype(bf16)
    b2_p = jnp.zeros((1, h_pad), f32).at[:, :n_hidden].set(b2.astype(f32))
    w3_t = jnp.zeros((h_pad, n_output), f32).at[:n_hidden, :].set(w3.T.astype(f32)).astype(bf16)
    b3_p = b3.astype(f32).reshape(1, n_output)

    return {
        "w1": w1_t, "b1": b1_p, "w2": w2_t, "b2": b2_p, "w3": w3_t, "b3": b3_p,
        "n_input": n_input, "n_hidden": n_hidden, "n_output": n_output, "h_pad": h_pad,
    }


def predator_nn_forward(x, prepped, *, batch_tile=2048):
    """x: (batch, n_input) f32.  prepped: output of prepare_params()."""
    n_input = prepped["n_input"]
    n_output = prepped["n_output"]
    h_pad = prepped["h_pad"]
    f32 = jnp.float32

    batch = x.shape[0]
    # Aim for >=2 grid tiles when the batch allows (keeps both v7x TensorCores busy
    # via the "parallel" axis); cap at batch_tile rows so the per-tile VMEM
    # footprint fits v5e's 16 MiB scoped default with room to spare.
    tb = max(_SUBLANES, min(batch_tile, _round_up(-(-batch // 2), _SUBLANES)))
    padded_batch = _round_up(batch, tb)

    x = x.astype(f32)
    if padded_batch != batch:
        x = jnp.pad(x, ((0, padded_batch - batch), (0, 0)))

    grid = (padded_batch // tb,)

    def resident(shape):
        # Constant index_map -> DMA'd once, stays VMEM-resident across grid steps.
        return pl.BlockSpec(shape, lambda i: (0, 0))

    flops = 2 * padded_batch * (n_input * h_pad + h_pad * h_pad + h_pad * n_output)
    transcendentals = padded_batch * (n_input + 2 * h_pad + n_output)
    bytes_accessed = (4 * padded_batch * (n_input + n_output)                        # x in, out (f32)
                      + 2 * (n_input * h_pad + h_pad * h_pad + h_pad * n_output)     # bf16 weights
                      + 4 * (2 * h_pad + n_output))                                  # f32 biases

    out = pl.pallas_call(
        _predator_kernel,
        out_shape=jax.ShapeDtypeStruct((padded_batch, n_output), f32),
        grid=grid,
        in_specs=[
            pl.BlockSpec((tb, n_input), lambda i: (i, 0)),   # x: batch-tiled, pipelined
            resident((n_input, h_pad)),
            resident((1, h_pad)),
            resident((h_pad, h_pad)),
            resident((1, h_pad)),
            resident((h_pad, n_output)),
            resident((1, n_output)),
        ],
        out_specs=pl.BlockSpec((tb, n_output), lambda i: (i, 0)),  # narrow logical output
        compiler_params=pltpu.CompilerParams(
            dimension_semantics=("parallel",)),
        cost_estimate=pl.CostEstimate(
            flops=int(flops),
            transcendentals=int(transcendentals),
            bytes_accessed=int(bytes_accessed),
        ),
    )(x, prepped["w1"], prepped["b1"], prepped["w2"], prepped["b2"],
      prepped["w3"], prepped["b3"])

    return out[:batch]


def _reference_forward(x, params):
    """Pure-JAX reference mirroring the PyTorch module (f32 throughout)."""
    out = jax.nn.sigmoid(x)
    out = jax.nn.sigmoid(out @ params["w1"].T + params["b1"])
    out = jax.nn.sigmoid(out @ params["w2"].T + params["b2"])
    out = out @ params["w3"].T + params["b3"]
    return jax.nn.softmax(out, axis=1)


def _init_params(key, n_input, n_hidden, n_output):
    """Deterministic init mimicking torch.nn.Linear (uniform +/- 1/sqrt(fan_in))."""
    ks = jax.random.split(key, 6)

    def lin(kw, kb, fan_in, fan_out):
        bound = 1.0 / jnp.sqrt(fan_in)
        w = jax.random.uniform(kw, (fan_out, fan_in), jnp.float32, -bound, bound)
        b = jax.random.uniform(kb, (fan_out,), jnp.float32, -bound, bound)
        return w, b

    w1, b1 = lin(ks[0], ks[1], n_input, n_hidden)
    w2, b2 = lin(ks[2], ks[3], n_hidden, n_hidden)
    w3, b3 = lin(ks[4], ks[5], n_hidden, n_output)
    return {"w1": w1, "b1": b1, "w2": w2, "b2": b2, "w3": w3, "b3": b3}


if __name__ == "__main__":
    key = jax.random.PRNGKey(0)
    k_param, k_x, k_x2 = jax.random.split(key, 3)

    batch, n_input, n_hidden, n_output = 8, 16, 32, 4
    params = _init_params(k_param, n_input, n_hidden, n_output)
    prepped = prepare_params(params)   # one-time weight prep (hoisted out of forward)

    # Main small-shape check (tolerance accounts for bf16 MXU operands + approx recip).
    x = jax.random.normal(k_x, (batch, n_input), jnp.float32)
    out = jax.block_until_ready(predator_nn_forward(x, prepped))
    ref = _reference_forward(x, params)
    assert out.shape == (batch, n_output)
    assert jnp.allclose(out, ref, atol=1e-2, rtol=1e-2), "mismatch vs reference"
    assert jnp.allclose(jnp.sum(out, axis=1), 1.0, atol=5e-3), "softmax rows must sum to 1"

    # Ragged-batch check (exercises wrapper-side batch padding / multi-tile grid).
    x2 = jax.random.normal(k_x2, (10, n_input), jnp.float32)
    out2 = jax.block_until_ready(predator_nn_forward(x2, prepped))
    ref2 = _reference_forward(x2, params)
    assert out2.shape == (10, n_output)
    assert jnp.allclose(out2, ref2, atol=1e-2, rtol=1e-2), "ragged-batch mismatch"

    print("KERNEL_OK")
</pallas_src>

<mosaic_0001>
module attributes {stable_mosaic.version = 11 : i64} {
  func.func @_predator_kernel(%arg0: i32, %arg1: memref<8x16xf32, #tpu.memory_space<vmem>>, %arg2: memref<16x128xbf16, #tpu.memory_space<vmem>>, %arg3: memref<1x128xf32, #tpu.memory_space<vmem>>, %arg4: memref<128x128xbf16, #tpu.memory_space<vmem>>, %arg5: memref<1x128xf32, #tpu.memory_space<vmem>>, %arg6: memref<128x4xbf16, #tpu.memory_space<vmem>>, %arg7: memref<1x4xf32, #tpu.memory_space<vmem>>, %arg8: memref<8x4xf32, #tpu.memory_space<vmem>>) attributes {dimension_semantics = [#tpu.dimension_semantics<parallel>], iteration_bounds = array<i64: 1>, scalar_prefetch = 0 : i64, scratch_operands = 0 : i64, tpu.core_type = #tpu.core_type<tc>, window_params = [{transform_indices = @transform_0, window_bounds = array<i64: 8, 16>}, {pipeline_mode = #tpu.pipeline_mode<synchronous>, transform_indices = @transform_1, window_bounds = array<i64: 16, 128>}, {pipeline_mode = #tpu.pipeline_mode<synchronous>, transform_indices = @transform_2, window_bounds = array<i64: 1, 128>}, {pipeline_mode = #tpu.pipeline_mode<synchronous>, transform_indices = @transform_3, window_bounds = array<i64: 128, 128>}, {pipeline_mode = #tpu.pipeline_mode<synchronous>, transform_indices = @transform_4, window_bounds = array<i64: 1, 128>}, {pipeline_mode = #tpu.pipeline_mode<synchronous>, transform_indices = @transform_5, window_bounds = array<i64: 128, 4>}, {pipeline_mode = #tpu.pipeline_mode<synchronous>, transform_indices = @transform_6, window_bounds = array<i64: 1, 4>}, {transform_indices = @transform_7, window_bounds = array<i64: 8, 4>}]} {
    %c0 = arith.constant 0 : index
    %c0_0 = arith.constant 0 : index
    %0 = vector.load %arg1[%c0, %c0_0] : memref<8x16xf32, #tpu.memory_space<vmem>>, vector<8x16xf32>
    %cst = arith.constant 5.000000e-01 : f32
    %1 = vector.broadcast %cst : f32 to vector<8x16xf32>
    %2 = arith.mulf %1, %0 : vector<8x16xf32>
    %3 = math.tanh %2 : vector<8x16xf32>
    %cst_1 = arith.constant 5.000000e-01 : f32
    %4 = vector.broadcast %cst_1 : f32 to vector<8x16xf32>
    %5 = arith.mulf %4, %3 : vector<8x16xf32>
    %cst_2 = arith.constant 5.000000e-01 : f32
    %6 = vector.broadcast %cst_2 : f32 to vector<8x16xf32>
    %7 = arith.addf %5, %6 : vector<8x16xf32>
    %8 = arith.truncf %7 : vector<8x16xf32> to vector<8x16xbf16>
    %c0_3 = arith.constant 0 : index
    %c0_4 = arith.constant 0 : index
    %9 = vector.load %arg2[%c0_3, %c0_4] : memref<16x128xbf16, #tpu.memory_space<vmem>>, vector<16x128xbf16>
    %cst_5 = arith.constant dense<0.000000e+00> : vector<8x128xf32>
    %10 = tpu.matmul %8, %9, %cst_5 {dimension_numbers = #tpu.dot_dimension_numbers<[1], [0], [0], [1], [0, 0, 1, 1], [], []>} : vector<8x16xbf16>, vector<16x128xbf16>, vector<8x128xf32> -> vector<8x128xf32>
    %c0_6 = arith.constant 0 : index
    %c0_7 = arith.constant 0 : index
    %11 = vector.load %arg3[%c0_6, %c0_7] : memref<1x128xf32, #tpu.memory_space<vmem>>, vector<1x128xf32>
    %12 = vector.broadcast %11 : vector<1x128xf32> to vector<8x128xf32>
    %13 = arith.addf %10, %12 : vector<8x128xf32>
    %cst_8 = arith.constant 5.000000e-01 : f32
    %14 = vector.broadcast %cst_8 : f32 to vector<8x128xf32>
    %15 = arith.mulf %14, %13 : vector<8x128xf32>
    %16 = math.tanh %15 : vector<8x128xf32>
    %cst_9 = arith.constant 5.000000e-01 : f32
    %17 = vector.broadcast %cst_9 : f32 to vector<8x128xf32>
    %18 = arith.mulf %17, %16 : vector<8x128xf32>
    %cst_10 = arith.constant 5.000000e-01 : f32
    %19 = vector.broadcast %cst_10 : f32 to vector<8x128xf32>
    %20 = arith.addf %18, %19 : vector<8x128xf32>
    %21 = arith.truncf %20 : vector<8x128xf32> to vector<8x128xbf16>
    %c0_11 = arith.constant 0 : index
    %c0_12 = arith.constant 0 : index
    %22 = vector.load %arg4[%c0_11, %c0_12] : memref<128x128xbf16, #tpu.memory_space<vmem>>, vector<128x128xbf16>
    %cst_13 = arith.constant dense<0.000000e+00> : vector<8x128xf32>
    %23 = tpu.matmul %21, %22, %cst_13 {dimension_numbers = #tpu.dot_dimension_numbers<[1], [0], [0], [1], [0, 0, 1, 1], [], []>} : vector<8x128xbf16>, vector<128x128xbf16>, vector<8x128xf32> -> vector<8x128xf32>
    %c0_14 = arith.constant 0 : index
    %c0_15 = arith.constant 0 : index
    %24 = vector.load %arg5[%c0_14, %c0_15] : memref<1x128xf32, #tpu.memory_space<vmem>>, vector<1x128xf32>
    %25 = vector.broadcast %24 : vector<1x128xf32> to vector<8x128xf32>
    %26 = arith.addf %23, %25 : vector<8x128xf32>
    %cst_16 = arith.constant 5.000000e-01 : f32
    %27 = vector.broadcast %cst_16 : f32 to vector<8x128xf32>
    %28 = arith.mulf %27, %26 : vector<8x128xf32>
    %29 = math.tanh %28 : vector<8x128xf32>
    %cst_17 = arith.constant 5.000000e-01 : f32
    %30 = vector.broadcast %cst_17 : f32 to vector<8x128xf32>
    %31 = arith.mulf %30, %29 : vector<8x128xf32>
    %cst_18 = arith.constant 5.000000e-01 : f32
    %32 = vector.broadcast %cst_18 : f32 to vector<8x128xf32>
    %33 = arith.addf %31, %32 : vector<8x128xf32>
    %34 = arith.truncf %33 : vector<8x128xf32> to vector<8x128xbf16>
    %c0_19 = arith.constant 0 : index
    %c0_20 = arith.constant 0 : index
    %35 = vector.load %arg6[%c0_19, %c0_20] : memref<128x4xbf16, #tpu.memory_space<vmem>>, vector<128x4xbf16>
    %cst_21 = arith.constant dense<0.000000e+00> : vector<8x4xf32>
    %36 = tpu.matmul %34, %35, %cst_21 {dimension_numbers = #tpu.dot_dimension_numbers<[1], [0], [0], [1], [0, 0, 1, 1], [], []>} : vector<8x128xbf16>, vector<128x4xbf16>, vector<8x4xf32> -> vector<8x4xf32>
    %c0_22 = arith.constant 0 : index
    %c0_23 = arith.constant 0 : index
    %37 = vector.load %arg7[%c0_22, %c0_23] : memref<1x4xf32, #tpu.memory_space<vmem>>, vector<1x4xf32>
    %38 = vector.broadcast %37 : vector<1x4xf32> to vector<8x4xf32>
    %39 = arith.addf %36, %38 : vector<8x4xf32>
    %cst_24 = arith.constant dense<0xFF800000> : vector<8xf32>
    %40 = vector.multi_reduction <maximumf>, %39, %cst_24 [1] : vector<8x4xf32> to vector<8xf32>
    %41 = vector.shape_cast %40 : vector<8xf32> to vector<8x1xf32>
    %42 = vector.broadcast %41 : vector<8x1xf32> to vector<8x4xf32>
    %43 = arith.subf %39, %42 : vector<8x4xf32>
    %44 = math.exp %43 : vector<8x4xf32>
    %cst_25 = arith.constant dense<0.000000e+00> : vector<8xf32>
    %45 = vector.multi_reduction <add>, %44, %cst_25 [1] : vector<8x4xf32> to vector<8xf32>
    %46 = vector.shape_cast %45 : vector<8xf32> to vector<8x1xf32>
    %47 = tpu.reciprocal %46 {approx = true} : vector<8x1xf32> -> vector<8x1xf32>
    %48 = vector.broadcast %47 : vector<8x1xf32> to vector<8x4xf32>
    %49 = arith.mulf %44, %48 : vector<8x4xf32>
    %c0_26 = arith.constant 0 : index
    %c0_27 = arith.constant 0 : index
    %50 = vector.load %arg8[%c0_26, %c0_27] : memref<8x4xf32, #tpu.memory_space<vmem>>, vector<8x4xf32>
    tpu.vector_store %arg8[%c0_26, %c0_27], %49 {strides = array<i32>} : memref<8x4xf32, #tpu.memory_space<vmem>>, vector<8x4xf32>,
    return
  }
  func.func @transform_0(%arg0: i32) -> (i32, i32) {
    %c0_i32 = arith.constant 0 : i32
    %c0_i32_0 = arith.constant 0 : i32
    return %arg0, %c0_i32 : i32, i32
  }
  func.func @transform_1(%arg0: i32) -> (i32, i32) {
    %c0_i32 = arith.constant 0 : i32
    %c0_i32_0 = arith.constant 0 : i32
    %c0_i32_1 = arith.constant 0 : i32
    return %c0_i32, %c0_i32_0 : i32, i32
  }
  func.func @transform_2(%arg0: i32) -> (i32, i32) {
    %c0_i32 = arith.constant 0 : i32
    %c0_i32_0 = arith.constant 0 : i32
    %c0_i32_1 = arith.constant 0 : i32
    return %c0_i32, %c0_i32_0 : i32, i32
  }
  func.func @transform_3(%arg0: i32) -> (i32, i32) {
    %c0_i32 = arith.constant 0 : i32
    %c0_i32_0 = arith.constant 0 : i32
    %c0_i32_1 = arith.constant 0 : i32
    return %c0_i32, %c0_i32_0 : i32, i32
  }
  func.func @transform_4(%arg0: i32) -> (i32, i32) {
    %c0_i32 = arith.constant 0 : i32
    %c0_i32_0 = arith.constant 0 : i32
    %c0_i32_1 = arith.constant 0 : i32
    return %c0_i32, %c0_i32_0 : i32, i32
  }
  func.func @transform_5(%arg0: i32) -> (i32, i32) {
    %c0_i32 = arith.constant 0 : i32
    %c0_i32_0 = arith.constant 0 : i32
    %c0_i32_1 = arith.constant 0 : i32
    return %c0_i32, %c0_i32_0 : i32, i32
  }
  func.func @transform_6(%arg0: i32) -> (i32, i32) {
    %c0_i32 = arith.constant 0 : i32
    %c0_i32_0 = arith.constant 0 : i32
    %c0_i32_1 = arith.constant 0 : i32
    return %c0_i32, %c0_i32_0 : i32, i32
  }
  func.func @transform_7(%arg0: i32) -> (i32, i32) {
    %c0_i32 = arith.constant 0 : i32
    %c0_i32_0 = arith.constant 0 : i32
    return %arg0, %c0_i32 : i32, i32
  }
}

</mosaic_0001>

<bundles_post_ra>
// kernel: tpu_custom_call.1
= control target key start
LH: loop header
LB: loop body
LE: loop exit
PB: predicated region body
PF: predicated region fallthrough
CT: control target
= control target key end

     0   :  { %12 = vsyncpa [#allocation3], 0  ;;  %s499_s24 = smov [#allocation2]   ;;  %s645_s0 = inlined_call_operand.vmem [shape: f32[8,16], index: 0, kind: input, shape index: {}]   ;;  %s646_s1 = inlined_call_operand.hbm [shape: bf16[16,128], index: 1, kind: input, shape index: {}]   ;;  %s647_s2 = inlined_call_operand.vmem [shape: f32[1,128], index: 2, kind: input, shape index: {}]   ;;  %s648_s3 = inlined_call_operand.vmem [shape: bf16[128,128], index: 3, kind: input, shape index: {}]   ;;  %s649_s4 = inlined_call_operand.vmem [shape: f32[1,128], index: 4, kind: input, shape index: {}]   ;;  %s650_s5 = inlined_call_operand.vmem [shape: bf16[128,4], index: 5, kind: input, shape index: {}]   ;;  %s651_s6 = inlined_call_operand.vmem [shape: f32[1,4], index: 6, kind: input, shape index: {}]   ;;  %s652_s7 = inlined_call_operand.vmem [shape: f32[8,4], index: 7, kind: output, shape index: {}]  }
   0x1   :  { %s20_s25 = sshll.u32 %s499_s24, 4  ;;  %s475_s28 = scalar_lea.hbm %s646_s1, 128  ;;  %s21_s25 = int_to_ptr.vmem [resolvable:$true] %s20_s25 }
   0x2   :  { %p476_p0 = scmp.ne.s32.totalorder %s646_s1, %s475_s28  ;;  %p479_p1 = scmp.lt.u32.totalorder %s475_s28, %s646_s1 }
   0x4   :  { %p481_p2 = pnand %p479_p1, %p476_p0 }
   0x6   :  { %484 = shalt.err (!%p481_p2)
}
   0x7   :  { %s485_s10 = scalar_lea.vmem %s21_s25, 128  ;;  %p490_p4 = scmp.lt.s32.totalorder %s21_s25, %s21_s25 }
   0x8   :  { %p486_p3 = scmp.ne.s32.totalorder %s21_s25, %s485_s10  ;;  %p491_p5 = scmp.lt.s32.totalorder %s485_s10, %s485_s10 }
   0xa   :  { %p492_p6 = por %p491_p5, %p490_p4 }
   0xc   :  { %p493_p7 = pnand %p492_p6, %p486_p3 }
   0xe   :  { %496 = shalt.err (!%p493_p7)
}
   0xf   :  { %s500_s11 = smov 64   ;;  %s501_s12 = smov 4  }
  0x10   :  { %26 = dma.hbm_to_vmem [thread:$0]  %s646_s1, 128, %s21_s25, [#allocation3], %s500_s11, %s500_s11, %s501_s12  }
  0x11   :  { %497 = dma.done.wait [#allocation3], 128  }
  0x12   :  { %498 = vsyncadd [#allocation3], 4294967168  ;;  %v502_v0 = vmov 0.0   ;;  %vm503_vm0 = vmmov 0   ;;  %v448_v1 = vld [vmem:[#allocation2] sm:$0xff]   ;;  %v450_v5 = vld [vmem:[%s648_s3 + $0x8] sm:$0xff]  }
  0x13   :  { %397 = vmatprep.subr.bf16.mxu0 %v502_v0  ;;  %399 = vmatprep.mubr.msk.bf16.mxu0 %vm503_vm0, %v502_v0  ;;  %v41_v2 = vld [vmem:[%s645_s0] sm:$0xff]  ;;  %v451_v6 = vld [vmem:[%s648_s3 + $0x10] sm:$0xff]   ;;  %vm62_vm1 = vcmask 130048   ;;  %v452_v11 = vld [vmem:[%s648_s3 + $0x18] sm:$0xff]   ;;  %vm338_vm2 = vcmask 31744  }
  0x14   :  { %403 = vmatprep.subr.bf16.mxu1 %v502_v0  ;;  %419 = vmatprep.mubr.msk.bf16.mxu1 %vm503_vm0, %v502_v0  ;;  %v42_v3 = vmul.f32 0.5, %v41_v2  ;;  %v449_v4 = vld [vmem:[%s648_s3] sm:$0xff]   ;;  %v454_v13 = vld [vmem:[%s648_s3 + $0x28] sm:$0xff]   ;;  %v455_v14 = vld [vmem:[%s648_s3 + $0x30] sm:$0xff]  }
  0x15   :  { %398 = vmatpush3.bf16.msra.mxu0 %v448_v1  ;;  %404 = vmatpush3.bf16.msra.mxu1 %v449_v4  ;;  %v453_v12 = vld [vmem:[%s648_s3 + $0x20] sm:$0xff]   ;;  %v456_v15 = vld [vmem:[%s648_s3 + $0x38] sm:$0xff]   ;;  %v458_v17 = vld [vmem:[%s650_s5 + $0x8] sm:$0xff]  }
  0x16   :  { %423 = vmatprep.subr.bf16.mxu0 %v502_v0  ;;  %465 = vtanh.f32 %v42_v3  ;;  %405 = vmatprep.subr.bf16.mxu1 %v502_v0  ;;  %v457_v16 = vld [vmem:[%s650_s5] sm:$0xff]   ;;  %v459_v18 = vld [vmem:[%s650_s5 + $0x10] sm:$0xff]   ;;  %v460_v30 = vld [vmem:[%s650_s5 + $0x18] sm:$0xff]  }
  0x17   :  { %v356_v19 = vld [vmem:[%s647_s2] ss:$0 sm:$0xff]  ;;  %v462_v32 = vld [vmem:[%s650_s5 + $0x28] sm:$0xff]   ;;  %v463_v33 = vld [vmem:[%s650_s5 + $0x30] sm:$0xff]  }
  0x18   :  { %v461_v31 = vld [vmem:[%s650_s5 + $0x20] sm:$0xff]   ;;  %v464_v34 = vld [vmem:[%s650_s5 + $0x38] sm:$0xff]  }
  0x19   :  { %406 = vmatpush3.bf16.msra.mxu1 %v450_v5  ;;  %v359_v35 = vld [vmem:[%s649_s4] ss:$0 sm:$0xff] }
  0x1a   :  { %407 = vmatprep.subr.bf16.mxu1 %v502_v0  ;;  %v368_v46 = vld [vmem:[%s651_s6] ss:$0 sm:$0xff] }
  0x1d   :  { %408 = vmatpush3.bf16.msra.mxu1 %v451_v6 }
  0x1e   :  { %409 = vmatprep.subr.bf16.mxu1 %v502_v0 }
  0x20   :  { %v466_v7 = vpop.eup %465 }
  0x21   :  { %v44_v8 = vmul.f32 0.5, %v466_v7  ;;  %410 = vmatpush3.bf16.msra.mxu1 %v452_v11 }
  0x22   :  { %411 = vmatprep.subr.bf16.mxu1 %v502_v0 }
  0x23   :  { %v45_v9 = vadd.f32 0.5, %v44_v8 }
  0x25   :  { %v46_v10 = vpack.c.bf16 %v45_v9, %v45_v9  ;;  %412 = vmatpush3.bf16.msra.mxu1 %v453_v12 }
  0x26   :  { %413 = vmatprep.subr.bf16.mxu1 %v502_v0 }
  0x27   :  { %400 = vmatmul.mubr.msk.bf16.vlgmr.msra.gmra.mrb[0].mxu0 %vm62_vm1, %v46_v10 }
  0x28   :  { %439 = vmatprep.mubr.msk.bf16.mxu0 %vm503_vm0, %v502_v0  ;;  %424 = vmatpush3.bf16.msra.mxu0 %v457_v16 }
  0x29   :  { %414 = vmatpush3.bf16.msra.mxu1 %v454_v13  ;;  %425 = vmatprep.subr.bf16.mxu0 %v502_v0 }
  0x2a   :  { %415 = vmatprep.subr.bf16.mxu1 %v502_v0 }
  0x2c   :  { %426 = vmatpush3.bf16.msra.mxu0 %v458_v17 }
  0x2d   :  { %416 = vmatpush3.bf16.msra.mxu1 %v455_v14  ;;  %427 = vmatprep.subr.bf16.mxu0 %v502_v0 }
  0x2e   :  { %417 = vmatprep.subr.bf16.mxu1 %v502_v0 }
  0x30   :  { %428 = vmatpush3.bf16.msra.mxu0 %v459_v18 }
  0x31   :  { %418 = vmatpush3.bf16.msra.mxu1 %v456_v15  ;;  %429 = vmatprep.subr.bf16.mxu0 %v502_v0 }
  0x34   :  { %430 = vmatpush3.bf16.msra.mxu0 %v460_v30 }
  0x35   :  { %431 = vmatprep.subr.bf16.mxu0 %v502_v0 }
  0x38   :  { %432 = vmatpush3.bf16.msra.mxu0 %v461_v31 }
  0x39   :  { %433 = vmatprep.subr.bf16.mxu0 %v502_v0 }
  0x3c   :  { %434 = vmatpush3.bf16.msra.mxu0 %v462_v32 }
  0x3d   :  { %435 = vmatprep.subr.bf16.mxu0 %v502_v0 }
  0x40   :  { %436 = vmatpush3.bf16.msra.mxu0 %v463_v33 }
  0x41   :  { %437 = vmatprep.subr.bf16.mxu0 %v502_v0 }
  0x44   :  { %438 = vmatpush3.bf16.msra.mxu0 %v464_v34 }
  0xfa   :  { %v100_v20 = vpop.f32.mrb[0].mxu0 }
  0xfb   :  { %v101_v21 = vadd.f32 %v356_v19, %v100_v20  ;;  %v401_v22 = vpop.f32.mrb[1].mxu0 }
  0xfc   :  { %v103_v23 = vpop.f32.mrb[2].mxu0 }
  0xfd   :  { %v106_v24 = vmul.f32 0.5, %v101_v21  ;;  %v402_v25 = vpop.f32.mrb[3].mxu0 }
  0xff   :  { %467 = vtanh.f32 %v106_v24 }
 0x109   :  { %v468_v26 = vpop.eup %467 }
 0x10a   :  { %v108_v27 = vmul.f32 0.5, %v468_v26 }
 0x10c   :  { %v109_v28 = vadd.f32 0.5, %v108_v27 }
 0x10e   :  { %v110_v29 = vpack.c.bf16 %v109_v28, %v109_v28 }
 0x110   :  { %420 = vmatmul.mubr.bf16.vlgmr.msra.gmra.mrb[0].mxu1 %v110_v29 }
 0x1e3   :  { %v216_v36 = vpop.f32.mrb[0].mxu1 }
 0x1e4   :  { %v217_v37 = vadd.f32 %v359_v35, %v216_v36  ;;  %v421_v38 = vpop.f32.mrb[1].mxu1 }
 0x1e5   :  { %v219_v39 = vpop.f32.mrb[2].mxu1 }
 0x1e6   :  { %v222_v40 = vmul.f32 0.5, %v217_v37  ;;  %v422_v41 = vpop.f32.mrb[3].mxu1 }
 0x1e8   :  { %469 = vtanh.f32 %v222_v40 }
 0x1f2   :  { %v470_v42 = vpop.eup %469 }
 0x1f3   :  { %v224_v43 = vmul.f32 0.5, %v470_v42 }
 0x1f5   :  { %v225_v44 = vadd.f32 0.5, %v224_v43 }
 0x1f7   :  { %v226_v45 = vpack.c.bf16 %v225_v44, %v225_v44 }
 0x1f9   :  { %440 = vmatmul.mubr.bf16.vlgmr.msra.gmra.mrb[4].mxu0 %v226_v45 }
 0x2cc   :  { %v332_v47 = vpop.f32.mrb[4].mxu0 }
 0x2cd   :  { %v333_v48 = vadd.f32 %v368_v46, %v332_v47  ;;  %v441_v49 = vpop.f32.mrb[5].mxu0 }
 0x2ce   :  { %v335_v50 = vpop.f32.mrb[6].mxu0 }
 0x2cf   :  { %v442_v51 = vpop.f32.mrb[7].mxu0  ;;  %v339_v52 = vsel %vm338_vm2, %v333_v48, -inf }
 0x2d0   :  { %340 = vmax.xlane.f32.xlu0 %v339_v52 }
 0x35d   :  { %v341_v53 = vpop.xlane.xlu0 %340 }
 0x35e   :  { %v342_v54 = vsub.f32 %v333_v48, %v341_v53 }
 0x360   :  { %v343_v55 = vmul.f32 1.442695, %v342_v54 }
 0x362   :  { %471 = vpow2.f32 %v343_v55 }
 0x36c   :  { %v472_v56 = vpop.eup %471 }
 0x36d   :  { %v345_v57 = vsel %vm338_vm2, %v472_v56, 0.0 }
 0x36e   :  { %346 = vadd.xlane.f32.xlu0 %v345_v57 }
 0x3fb   :  { %v347_v58 = vpop.xlane.xlu0 %346 }
 0x3fc   :  { %473 = vrcp.f32 %v347_v58 }
 0x406   :  { %v474_v59 = vpop.eup %473 }
 0x407   :  { %v349_v60 = vmul.f32 %v474_v59, %v472_v56 }
 0x409   :  { %350 = vst.msk [vmem:[%s652_s7] sm:$0xff] %vm338_vm2, %v349_v60 }
 0x40a   :  { %355 = vsyncpa [#allocation3], 1 }

</bundles_post_ra>
